<compile_context>
chip_gen: v7x
topology: tpu7x:2x2x1
jax: 0.10.0
libtpu: 0.0.40
codegen_flags: <defaults>
</compile_context>

<pallas_src>
import functools
import math

import jax
import jax.numpy as jnp
from jax import lax
from jax.experimental import pallas as pl
from jax.experimental.pallas import tpu as pltpu


# ----------------------------------------------------------------------------
# positional encodings (module __init__-time constants, plain JAX glue)
# ----------------------------------------------------------------------------
def compute_pos_1d(max_seq_len: int, no_pos_bins_1d: int) -> jnp.ndarray:
    pos = jnp.arange(max_seq_len)
    rel = (pos[:, None] & (1 << jnp.arange(no_pos_bins_1d))[None, :]) > 0
    return rel.astype(jnp.float32)


def compute_pos_2d(max_seq_len: int, pos_wsize_2d: int) -> jnp.ndarray:
    # Only used by the pure-JAX reference; the Pallas pair kernel never builds it.
    pos = jnp.arange(max_seq_len)
    rel = jnp.clip(pos[None, :] - pos[:, None], -pos_wsize_2d, pos_wsize_2d)
    return jax.nn.one_hot(rel + pos_wsize_2d, 2 * pos_wsize_2d + 1, dtype=jnp.float32)


# ----------------------------------------------------------------------------
# tiling helpers
# ----------------------------------------------------------------------------
def _largest_divisor(n: int, target: int, multiple_of: int = 1):
    for b in range(min(n, max(target, 1)), 0, -1):
        if n % b == 0 and b % multiple_of == 0:
            return b
    return None


def _pick_i_block(n_res: int, target: int) -> int:
    # second-minor block dim: multiple of 8, or the full dim (always legal).
    return _largest_divisor(n_res, target, 8) or n_res


def _pick_j_block(n_res: int, c_z: int, lane_target: int) -> int:
    # fused trailing dim j_blk*c_z must be a multiple of 128, or the full dim.
    step = 128 // math.gcd(c_z, 128)
    tgt = max(step, lane_target // max(c_z, 1))
    return _largest_divisor(n_res, tgt, step) or n_res


def _pick_s_block(n_seq: int, n_res: int, msa_dim: int, c_m: int,
                  target: int, budget_bytes: int = 8 << 20) -> int:
    # Keep double-buffered (msa in + padded out) blocks under ~8 MiB so the
    # default scoped VMEM (16 MiB on v5e, 32 MiB on v6e/v7x) is never exceeded.
    pad = lambda x: -(-x // 128) * 128
    per_seq = 8 * n_res * (pad(msa_dim) + pad(c_m))      # f32, x2 double buffer
    cap = max(1, budget_bytes // max(per_seq, 1))
    return _largest_divisor(n_seq, min(max(target, 1), cap), 1) or 1


# ----------------------------------------------------------------------------
# Pallas kernels
# ----------------------------------------------------------------------------
def _msa_kernel(msa_ref, base_ref, w_ref, b_ref, out_ref):
    """One block of s_blk MSA sequences: single fused matmul + broadcast add."""
    s_blk, n_res, msa_dim = msa_ref.shape
    c_m = out_ref.shape[-1]
    x = msa_ref[...].astype(jnp.float32).reshape(s_blk * n_res, msa_dim)
    y = jnp.dot(x, w_ref[...], preferred_element_type=jnp.float32) + b_ref[...]
    out = y.reshape(s_blk, n_res, c_m) + base_ref[...][None, :, :]
    out_ref[...] = out.astype(out_ref.dtype)


def _pair_kernel(tfi_rep_ref, tfj_slab_ref, jpos_ref, table_ref, out_ref,
                 *, c_z, nbins, i_blk, j_blk):
    """(i_blk, j_blk*c_z) lane-dense tile of the pair embedding.

    pair[i, j*c_z + c] = table[clip(j - i, -w, w) + w, c] + tf_i[i, c] + tf_j[j, c]

    Off-band tiles (|j-i| >= wsize everywhere) take a fast path: constant
    table row + the tf_i/tf_j slabs.  In-band tiles rebuild rel with a 2-D
    iota and resolve the lookup with nbins selects (no one-hot, no MXU).
    """
    wsize = (nbins - 1) // 2
    fused = j_blk * c_z
    i0 = pl.program_id(0) * i_blk
    j0 = pl.program_id(1) * j_blk

    base = tfi_rep_ref[...] + tfj_slab_ref[...]      # (i_blk, fused) + (1, fused)
    tbl = table_ref[...]                              # (nbins, fused) pre-tiled rows

    d_min = j0 - (i0 + i_blk - 1)                    # min(j - i) over the tile
    d_max = (j0 + j_blk - 1) - i0                    # max(j - i) over the tile

    @pl.when(d_min >= wsize)                          # whole tile clipped to +wsize
    def _():
        out_ref[...] = (base + tbl[nbins - 1:nbins, :]).astype(out_ref.dtype)

    @pl.when(d_max <= -wsize)                         # whole tile clipped to -wsize
    def _():
        out_ref[...] = (base + tbl[0:1, :]).astype(out_ref.dtype)

    @pl.when((d_min < wsize) & (d_max > -wsize))      # diagonal band: full path
    def _():
        ii = i0 + lax.broadcasted_iota(jnp.int32, (i_blk, fused), 0)
        rel = jnp.clip(jpos_ref[...] - ii, -wsize, wsize) + wsize    # (i_blk, fused)
        acc = jnp.broadcast_to(tbl[0:1, :], (i_blk, fused))
        for b in range(1, nbins):                     # nbins-1 selects, band tiles only
            acc = jnp.where(rel == b, tbl[b:b + 1, :], acc)
        out_ref[...] = (base + acc).astype(out_ref.dtype)


# ----------------------------------------------------------------------------
# wrapper
# ----------------------------------------------------------------------------
@functools.partial(jax.jit,
                   static_argnames=("s_blk_target", "i_blk_target", "pair_lane_target"))
def input_embedder2_forward(tf, msa, params, pos_1d, *,
                            s_blk_target: int = 16,
                            i_blk_target: int = 64,
                            pair_lane_target: int = 1024):
    n_seq, n_res, msa_dim = msa.shape
    c_m = params["w_tf_m"].shape[1]
    c_z = params["w_tf_z_i"].shape[1]
    nbins = params["w_pos_2d"].shape[0]
    f32 = jnp.float32
    tf32 = tf.astype(f32)

    # --- grid-invariant projections: tiny, plain JAX (no extra kernel launch) ---
    base = (tf32 @ params["w_tf_m"] + params["b_tf_m"]
            + pos_1d[:n_res].astype(f32) @ params["w_pos_1d"] + params["b_pos_1d"])
    tf_i = tf32 @ params["w_tf_z_i"] + params["b_tf_z_i"]                # (n_res, c_z)
    tf_j = tf32 @ params["w_tf_z_j"] + params["b_tf_z_j"]                # (n_res, c_z)
    # one_hot @ W + b == row lookup of (W + b): keep only the nbins-row table.
    table = params["w_pos_2d"] + params["b_pos_2d"]                       # (nbins, c_z)

    # --- msa_emb: s_blk sequences per grid step, VMEM-budgeted ---------------
    s_blk = _pick_s_block(n_seq, n_res, msa_dim, c_m, s_blk_target)
    msa_emb = pl.pallas_call(
        _msa_kernel,
        out_shape=jax.ShapeDtypeStruct((n_seq, n_res, c_m), tf.dtype),
        grid=(n_seq // s_blk,),
        in_specs=[
            pl.BlockSpec((s_blk, n_res, msa_dim), lambda s: (s, 0, 0)),
            pl.BlockSpec((n_res, c_m), lambda s: (0, 0)),
            pl.BlockSpec((msa_dim, c_m), lambda s: (0, 0)),
            pl.BlockSpec((1, c_m), lambda s: (0, 0)),
        ],
        out_specs=pl.BlockSpec((s_blk, n_res, c_m), lambda s: (s, 0, 0)),
        compiler_params=pltpu.CompilerParams(dimension_semantics=("parallel",)),
    )(msa, base, params["w_msa_m"], params["b_msa_m"])

    # --- pair_emb: lane-dense (n_res, n_res*c_z) slab, band-skip kernel ------
    i_blk = _pick_i_block(n_res, i_blk_target)
    j_blk = _pick_j_block(n_res, c_z, pair_lane_target)
    fused = j_blk * c_z

    # lane-dense side inputs (tiny; the tf_i slab is only re-DMA'd when the
    # i tile changes because its index map is constant along the fast j axis).
    tfi_rep = jnp.tile(tf_i, (1, j_blk))                                   # (n_res, fused)
    tfj_slab = tf_j.reshape(1, n_res * c_z)                                # (1, n_res*c_z)
    jpos_slab = jnp.repeat(jnp.arange(n_res, dtype=jnp.int32), c_z).reshape(1, n_res * c_z)
    table_tiled = jnp.tile(table, (1, j_blk))                               # (nbins, fused)

    pair_flat = pl.pallas_call(
        functools.partial(_pair_kernel, c_z=c_z, nbins=nbins, i_blk=i_blk, j_blk=j_blk),
        out_shape=jax.ShapeDtypeStruct((n_res, n_res * c_z), tf.dtype),
        grid=(n_res // i_blk, n_res // j_blk),
        in_specs=[
            pl.BlockSpec((i_blk, fused), lambda i, j: (i, 0)),
            pl.BlockSpec((1, fused), lambda i, j: (0, j)),
            pl.BlockSpec((1, fused), lambda i, j: (0, j)),
            pl.BlockSpec((nbins, fused), lambda i, j: (0, 0)),
        ],
        out_specs=pl.BlockSpec((i_blk, fused), lambda i, j: (i, j)),
        compiler_params=pltpu.CompilerParams(
            dimension_semantics=("parallel", "parallel")),
    )(tfi_rep, tfj_slab, jpos_slab, table_tiled)

    pair_emb = pair_flat.reshape(n_res, n_res, c_z)   # free: row-major contiguous
    return msa_emb, pair_emb


# ----------------------------------------------------------------------------
# pure-JAX reference (mirrors the PyTorch forward, incl. explicit pos_2d path)
# ----------------------------------------------------------------------------
def reference_forward(tf, msa, params, pos_1d, pos_2d):
    n_res = tf.shape[-2]
    tf_emb_m = tf @ params["w_tf_m"] + params["b_tf_m"]
    msa_emb_m = msa @ params["w_msa_m"] + params["b_msa_m"]
    pos1 = pos_1d[:n_res] @ params["w_pos_1d"] + params["b_pos_1d"]
    msa_emb = msa_emb_m + tf_emb_m[None, :, :] + pos1[None, :, :]

    tf_i = tf @ params["w_tf_z_i"] + params["b_tf_z_i"]
    tf_j = tf @ params["w_tf_z_j"] + params["b_tf_z_j"]
    pair = pos_2d[:n_res, :n_res] @ params["w_pos_2d"] + params["b_pos_2d"]
    pair = pair + tf_i[:, None, :] + tf_j[None, :, :]
    return msa_emb, pair


# ----------------------------------------------------------------------------
# deterministic parameter init (synthetic weights, shapes from __init__)
# ----------------------------------------------------------------------------
def init_params(key, tf_dim, msa_dim, c_m, c_z, no_pos_bins_1d, no_pos_bins_2d):
    def lin(k, din, dout):
        kw, kb = jax.random.split(k)
        w = jax.random.normal(kw, (din, dout), jnp.float32) / jnp.sqrt(din)
        b = 0.01 * jax.random.normal(kb, (1, dout), jnp.float32)
        return w, b

    keys = jax.random.split(key, 6)
    p = {}
    p["w_tf_m"], p["b_tf_m"] = lin(keys[0], tf_dim, c_m)
    p["w_msa_m"], p["b_msa_m"] = lin(keys[1], msa_dim, c_m)
    p["w_pos_1d"], p["b_pos_1d"] = lin(keys[2], no_pos_bins_1d, c_m)
    p["w_tf_z_i"], p["b_tf_z_i"] = lin(keys[3], tf_dim, c_z)
    p["w_tf_z_j"], p["b_tf_z_j"] = lin(keys[4], tf_dim, c_z)
    p["w_pos_2d"], p["b_pos_2d"] = lin(keys[5], no_pos_bins_2d, c_z)
    return p


if __name__ == "__main__":
    # module hyper-params (small)
    tf_dim = 22
    msa_dim = 49
    c_m = 32
    c_z = 16
    max_len_seq = 64
    no_pos_bins_1d = 14
    pos_wsize_2d = 3
    no_pos_bins_2d = 2 * pos_wsize_2d + 1

    # small example shapes
    n_seq = 8
    n_res = 32

    key = jax.random.PRNGKey(0)
    k_tf, k_msa, k_par = jax.random.split(key, 3)

    tf = jax.random.normal(k_tf, (n_res, tf_dim), jnp.float32)
    msa = jax.random.normal(k_msa, (n_seq, n_res, msa_dim), jnp.float32)

    params = init_params(k_par, tf_dim, msa_dim, c_m, c_z,
                         no_pos_bins_1d, no_pos_bins_2d)
    pos_1d = compute_pos_1d(max_len_seq, no_pos_bins_1d)
    pos_2d = compute_pos_2d(max_len_seq, pos_wsize_2d)   # reference only

    # Small block targets so the demo exercises a multi-step 2-D grid and all
    # three pair-kernel branches (both off-band fast paths + the band path).
    # Production defaults (s_blk~16, i_blk~64, pair_lane_target~1024) keep
    # every double-buffered block well under the default scoped VMEM on
    # v5e/v6e/v7x; sweep upward on v6e, keep modest on v7x (64 MiB VMEM, 2 TCs).
    msa_emb, pair_emb = input_embedder2_forward(
        tf, msa, params, pos_1d,
        s_blk_target=4, i_blk_target=8, pair_lane_target=128)
    jax.block_until_ready((msa_emb, pair_emb))

    ref_msa, ref_pair = reference_forward(tf, msa, params, pos_1d, pos_2d)
    assert msa_emb.shape == (n_seq, n_res, c_m)
    assert pair_emb.shape == (n_res, n_res, c_z)
    # Default MXU matmul precision (bf16 passes) both in-kernel and in the
    # reference; a loose tolerance covers rounding, a real bug gives O(1) error.
    assert jnp.allclose(msa_emb, ref_msa, atol=2e-2, rtol=2e-2)
    assert jnp.allclose(pair_emb, ref_pair, atol=2e-2, rtol=2e-2)

    print("KERNEL_OK")
</pallas_src>

<mosaic_0001>
module attributes {stable_mosaic.version = 11 : i64} {
  func.func @_pair_kernel(%arg0: i32, %arg1: i32, %arg2: memref<8x128xf32, #tpu.memory_space<vmem>>, %arg3: memref<1x128xf32, #tpu.memory_space<vmem>>, %arg4: memref<1x128xi32, #tpu.memory_space<vmem>>, %arg5: memref<7x128xf32, #tpu.memory_space<vmem>>, %arg6: memref<8x128xf32, #tpu.memory_space<vmem>>) attributes {dimension_semantics = [#tpu.dimension_semantics<parallel>, #tpu.dimension_semantics<parallel>], iteration_bounds = array<i64: 4, 4>, scalar_prefetch = 0 : i64, scratch_operands = 0 : i64, tpu.core_type = #tpu.core_type<tc>, window_params = [{transform_indices = @transform_0, window_bounds = array<i64: 8, 128>}, {transform_indices = @transform_1, window_bounds = array<i64: 1, 128>}, {transform_indices = @transform_2, window_bounds = array<i64: 1, 128>}, {pipeline_mode = #tpu.pipeline_mode<synchronous>, transform_indices = @transform_3, window_bounds = array<i64: 7, 128>}, {transform_indices = @transform_4, window_bounds = array<i64: 8, 128>}]} {
    %c8_i32 = arith.constant 8 : i32
    %0 = arith.muli %arg0, %c8_i32 : i32
    %c8_i32_0 = arith.constant 8 : i32
    %1 = arith.muli %arg1, %c8_i32_0 : i32
    %c0 = arith.constant 0 : index
    %c0_1 = arith.constant 0 : index
    %2 = vector.load %arg2[%c0, %c0_1] : memref<8x128xf32, #tpu.memory_space<vmem>>, vector<8x128xf32>
    %c0_2 = arith.constant 0 : index
    %c0_3 = arith.constant 0 : index
    %3 = vector.load %arg3[%c0_2, %c0_3] : memref<1x128xf32, #tpu.memory_space<vmem>>, vector<1x128xf32>
    %4 = vector.broadcast %3 : vector<1x128xf32> to vector<8x128xf32>
    %5 = arith.addf %2, %4 : vector<8x128xf32>
    %c0_4 = arith.constant 0 : index
    %c0_5 = arith.constant 0 : index
    %6 = vector.load %arg5[%c0_4, %c0_5] : memref<7x128xf32, #tpu.memory_space<vmem>>, vector<7x128xf32>
    %c8_i32_6 = arith.constant 8 : i32
    %7 = arith.addi %0, %c8_i32_6 : i32
    %c1_i32 = arith.constant 1 : i32
    %8 = arith.subi %7, %c1_i32 : i32
    %9 = arith.subi %1, %8 : i32
    %c8_i32_7 = arith.constant 8 : i32
    %10 = arith.addi %1, %c8_i32_7 : i32
    %c1_i32_8 = arith.constant 1 : i32
    %11 = arith.subi %10, %c1_i32_8 : i32
    %12 = arith.subi %11, %0 : i32
    %c3_i32 = arith.constant 3 : i32
    %13 = arith.cmpi sge, %9, %c3_i32 : i32
    %14 = arith.extui %13 : i1 to i32
    %c0_i32 = arith.constant 0 : i32
    %15 = arith.cmpi ne, %14, %c0_i32 : i32
    scf.if %15 {
      %24 = vector.extract_strided_slice %6 {offsets = [6, 0], sizes = [1, 128], strides = [1, 1]} : vector<7x128xf32> to vector<1x128xf32>
      %25 = vector.broadcast %24 : vector<1x128xf32> to vector<8x128xf32>
      %26 = arith.addf %5, %25 : vector<8x128xf32>
      %c0_13 = arith.constant 0 : index
      %c0_14 = arith.constant 0 : index
      %27 = vector.load %arg6[%c0_13, %c0_14] : memref<8x128xf32, #tpu.memory_space<vmem>>, vector<8x128xf32>
      tpu.vector_store %arg6[%c0_13, %c0_14], %26 {strides = array<i32>} : memref<8x128xf32, #tpu.memory_space<vmem>>, vector<8x128xf32>,
    } else {
    }
    %c-3_i32 = arith.constant -3 : i32
    %16 = arith.cmpi sle, %12, %c-3_i32 : i32
    %17 = arith.extui %16 : i1 to i32
    %c0_i32_9 = arith.constant 0 : i32
    %18 = arith.cmpi ne, %17, %c0_i32_9 : i32
    scf.if %18 {
      %24 = vector.extract_strided_slice %6 {offsets = [0, 0], sizes = [1, 128], strides = [1, 1]} : vector<7x128xf32> to vector<1x128xf32>
      %25 = vector.broadcast %24 : vector<1x128xf32> to vector<8x128xf32>
      %26 = arith.addf %5, %25 : vector<8x128xf32>
      %c0_13 = arith.constant 0 : index
      %c0_14 = arith.constant 0 : index
      %27 = vector.load %arg6[%c0_13, %c0_14] : memref<8x128xf32, #tpu.memory_space<vmem>>, vector<8x128xf32>
      tpu.vector_store %arg6[%c0_13, %c0_14], %26 {strides = array<i32>} : memref<8x128xf32, #tpu.memory_space<vmem>>, vector<8x128xf32>,
    } else {
    }
    %c3_i32_10 = arith.constant 3 : i32
    %19 = arith.cmpi slt, %9, %c3_i32_10 : i32
    %c-3_i32_11 = arith.constant -3 : i32
    %20 = arith.cmpi sgt, %12, %c-3_i32_11 : i32
    %21 = arith.andi %19, %20 : i1
    %22 = arith.extui %21 : i1 to i32
    %c0_i32_12 = arith.constant 0 : i32
    %23 = arith.cmpi ne, %22, %c0_i32_12 : i32
    scf.if %23 {
      %24 = tpu.iota {dimensions = array<i32: 0>} : vector<8x128xi32>
      %25 = vector.broadcast %0 : i32 to vector<8x128xi32>
      %26 = arith.addi %25, %24 : vector<8x128xi32>
      %c0_13 = arith.constant 0 : index
      %c0_14 = arith.constant 0 : index
      %27 = vector.load %arg4[%c0_13, %c0_14] : memref<1x128xi32, #tpu.memory_space<vmem>>, vector<1x128xi32>
      %28 = vector.broadcast %27 : vector<1x128xi32> to vector<8x128xi32>
      %29 = arith.subi %28, %26 : vector<8x128xi32>
      %c-3_i32_15 = arith.constant -3 : i32
      %c3_i32_16 = arith.constant 3 : i32
      %30 = vector.broadcast %c-3_i32_15 : i32 to vector<8x128xi32>
      %31 = arith.maxsi %30, %29 : vector<8x128xi32>
      %32 = vector.broadcast %c3_i32_16 : i32 to vector<8x128xi32>
      %33 = arith.minsi %32, %31 : vector<8x128xi32>
      %c3_i32_17 = arith.constant 3 : i32
      %34 = vector.broadcast %c3_i32_17 : i32 to vector<8x128xi32>
      %35 = arith.addi %33, %34 : vector<8x128xi32>
      %36 = vector.extract_strided_slice %6 {offsets = [0, 0], sizes = [1, 128], strides = [1, 1]} : vector<7x128xf32> to vector<1x128xf32>
      %37 = vector.shape_cast %36 : vector<1x128xf32> to vector<1x128xf32>
      %38 = vector.broadcast %37 : vector<1x128xf32> to vector<8x128xf32>
      %c1_i32_18 = arith.constant 1 : i32
      %39 = vector.broadcast %c1_i32_18 : i32 to vector<8x128xi32>
      %40 = arith.cmpi eq, %35, %39 : vector<8x128xi32>
      %41 = vector.extract_strided_slice %6 {offsets = [1, 0], sizes = [1, 128], strides = [1, 1]} : vector<7x128xf32> to vector<1x128xf32>
      %42 = vector.shape_cast %41 : vector<1x128xf32> to vector<1x128xf32>
      %43 = vector.broadcast %42 : vector<1x128xf32> to vector<8x128xf32>
      %44 = arith.select %40, %43, %38 : vector<8x128xi1>, vector<8x128xf32>
      %c2_i32 = arith.constant 2 : i32
      %45 = vector.broadcast %c2_i32 : i32 to vector<8x128xi32>
      %46 = arith.cmpi eq, %35, %45 : vector<8x128xi32>
      %47 = vector.extract_strided_slice %6 {offsets = [2, 0], sizes = [1, 128], strides = [1, 1]} : vector<7x128xf32> to vector<1x128xf32>
      %48 = vector.shape_cast %47 : vector<1x128xf32> to vector<1x128xf32>
      %49 = vector.broadcast %48 : vector<1x128xf32> to vector<8x128xf32>
      %50 = arith.select %46, %49, %44 : vector<8x128xi1>, vector<8x128xf32>
      %c3_i32_19 = arith.constant 3 : i32
      %51 = vector.broadcast %c3_i32_19 : i32 to vector<8x128xi32>
      %52 = arith.cmpi eq, %35, %51 : vector<8x128xi32>
      %53 = vector.extract_strided_slice %6 {offsets = [3, 0], sizes = [1, 128], strides = [1, 1]} : vector<7x128xf32> to vector<1x128xf32>
      %54 = vector.shape_cast %53 : vector<1x128xf32> to vector<1x128xf32>
      %55 = vector.broadcast %54 : vector<1x128xf32> to vector<8x128xf32>
      %56 = arith.select %52, %55, %50 : vector<8x128xi1>, vector<8x128xf32>
      %c4_i32 = arith.constant 4 : i32
      %57 = vector.broadcast %c4_i32 : i32 to vector<8x128xi32>
      %58 = arith.cmpi eq, %35, %57 : vector<8x128xi32>
      %59 = vector.extract_strided_slice %6 {offsets = [4, 0], sizes = [1, 128], strides = [1, 1]} : vector<7x128xf32> to vector<1x128xf32>
      %60 = vector.shape_cast %59 : vector<1x128xf32> to vector<1x128xf32>
      %61 = vector.broadcast %60 : vector<1x128xf32> to vector<8x128xf32>
      %62 = arith.select %58, %61, %56 : vector<8x128xi1>, vector<8x128xf32>
      %c5_i32 = arith.constant 5 : i32
      %63 = vector.broadcast %c5_i32 : i32 to vector<8x128xi32>
      %64 = arith.cmpi eq, %35, %63 : vector<8x128xi32>
      %65 = vector.extract_strided_slice %6 {offsets = [5, 0], sizes = [1, 128], strides = [1, 1]} : vector<7x128xf32> to vector<1x128xf32>
      %66 = vector.shape_cast %65 : vector<1x128xf32> to vector<1x128xf32>
      %67 = vector.broadcast %66 : vector<1x128xf32> to vector<8x128xf32>
      %68 = arith.select %64, %67, %62 : vector<8x128xi1>, vector<8x128xf32>
      %c6_i32 = arith.constant 6 : i32
      %69 = vector.broadcast %c6_i32 : i32 to vector<8x128xi32>
      %70 = arith.cmpi eq, %35, %69 : vector<8x128xi32>
      %71 = vector.extract_strided_slice %6 {offsets = [6, 0], sizes = [1, 128], strides = [1, 1]} : vector<7x128xf32> to vector<1x128xf32>
      %72 = vector.shape_cast %71 : vector<1x128xf32> to vector<1x128xf32>
      %73 = vector.broadcast %72 : vector<1x128xf32> to vector<8x128xf32>
      %74 = arith.select %70, %73, %68 : vector<8x128xi1>, vector<8x128xf32>
      %75 = arith.addf %5, %74 : vector<8x128xf32>
      %c0_20 = arith.constant 0 : index
      %c0_21 = arith.constant 0 : index
      %76 = vector.load %arg6[%c0_20, %c0_21] : memref<8x128xf32, #tpu.memory_space<vmem>>, vector<8x128xf32>
      tpu.vector_store %arg6[%c0_20, %c0_21], %75 {strides = array<i32>} : memref<8x128xf32, #tpu.memory_space<vmem>>, vector<8x128xf32>,
    } else {
    }
    return
  }
  func.func @transform_0(%arg0: i32, %arg1: i32) -> (i32, i32) {
    %c0_i32 = arith.constant 0 : i32
    %c0_i32_0 = arith.constant 0 : i32
    return %arg0, %c0_i32 : i32, i32
  }
  func.func @transform_1(%arg0: i32, %arg1: i32) -> (i32, i32) {
    %c0_i32 = arith.constant 0 : i32
    %c0_i32_0 = arith.constant 0 : i32
    return %c0_i32, %arg1 : i32, i32
  }
  func.func @transform_2(%arg0: i32, %arg1: i32) -> (i32, i32) {
    %c0_i32 = arith.constant 0 : i32
    %c0_i32_0 = arith.constant 0 : i32
    return %c0_i32, %arg1 : i32, i32
  }
  func.func @transform_3(%arg0: i32, %arg1: i32) -> (i32, i32) {
    %c0_i32 = arith.constant 0 : i32
    %c0_i32_0 = arith.constant 0 : i32
    %c0_i32_1 = arith.constant 0 : i32
    return %c0_i32, %c0_i32_0 : i32, i32
  }
  func.func @transform_4(%arg0: i32, %arg1: i32) -> (i32, i32) {
    %c0_i32 = arith.constant 0 : i32
    return %arg0, %arg1 : i32, i32
  }
}

module attributes {stable_mosaic.version = 11 : i64} {
  func.func @_msa_kernel(%arg0: i32, %arg1: memref<4x32x49xf32, #tpu.memory_space<vmem>>, %arg2: memref<32x32xf32, #tpu.memory_space<vmem>>, %arg3: memref<49x32xf32, #tpu.memory_space<vmem>>, %arg4: memref<1x32xf32, #tpu.memory_space<vmem>>, %arg5: memref<4x32x32xf32, #tpu.memory_space<vmem>>) attributes {dimension_semantics = [#tpu.dimension_semantics<parallel>], iteration_bounds = array<i64: 2>, scalar_prefetch = 0 : i64, scratch_operands = 0 : i64, tpu.core_type = #tpu.core_type<tc>, window_params = [{transform_indices = @transform_0, window_bounds = array<i64: 4, 32, 49>}, {pipeline_mode = #tpu.pipeline_mode<synchronous>, transform_indices = @transform_1, window_bounds = array<i64: 32, 32>}, {pipeline_mode = #tpu.pipeline_mode<synchronous>, transform_indices = @transform_2, window_bounds = array<i64: 49, 32>}, {pipeline_mode = #tpu.pipeline_mode<synchronous>, transform_indices = @transform_3, window_bounds = array<i64: 1, 32>}, {transform_indices = @transform_4, window_bounds = array<i64: 4, 32, 32>}]} {
    %c0 = arith.constant 0 : index
    %c0_0 = arith.constant 0 : index
    %c0_1 = arith.constant 0 : index
    %0 = vector.load %arg1[%c0, %c0_0, %c0_1] : memref<4x32x49xf32, #tpu.memory_space<vmem>>, vector<4x32x49xf32>
    %1 = vector.shape_cast %0 : vector<4x32x49xf32> to vector<128x49xf32>
    %c0_2 = arith.constant 0 : index
    %c0_3 = arith.constant 0 : index
    %2 = vector.load %arg3[%c0_2, %c0_3] : memref<49x32xf32, #tpu.memory_space<vmem>>, vector<49x32xf32>
    %cst = arith.constant dense<0.000000e+00> : vector<128x32xf32>
    %3 = tpu.matmul %1, %2, %cst {dimension_numbers = #tpu.dot_dimension_numbers<[1], [0], [0], [1], [0, 0, 1, 1], [], []>} : vector<128x49xf32>, vector<49x32xf32>, vector<128x32xf32> -> vector<128x32xf32>
    %c0_4 = arith.constant 0 : index
    %c0_5 = arith.constant 0 : index
    %4 = vector.load %arg4[%c0_4, %c0_5] : memref<1x32xf32, #tpu.memory_space<vmem>>, vector<1x32xf32>
    %5 = vector.broadcast %4 : vector<1x32xf32> to vector<128x32xf32>
    %6 = arith.addf %3, %5 : vector<128x32xf32>
    %7 = vector.shape_cast %6 : vector<128x32xf32> to vector<4x32x32xf32>
    %c0_6 = arith.constant 0 : index
    %c0_7 = arith.constant 0 : index
    %8 = vector.load %arg2[%c0_6, %c0_7] : memref<32x32xf32, #tpu.memory_space<vmem>>, vector<32x32xf32>
    %9 = vector.shape_cast %8 : vector<32x32xf32> to vector<1x32x32xf32>
    %10 = vector.broadcast %9 : vector<1x32x32xf32> to vector<4x32x32xf32>
    %11 = arith.addf %7, %10 : vector<4x32x32xf32>
    %c0_8 = arith.constant 0 : index
    %c0_9 = arith.constant 0 : index
    %c0_10 = arith.constant 0 : index
    %12 = vector.load %arg5[%c0_8, %c0_9, %c0_10] : memref<4x32x32xf32, #tpu.memory_space<vmem>>, vector<4x32x32xf32>
    tpu.vector_store %arg5[%c0_8, %c0_9, %c0_10], %11 {strides = array<i32>} : memref<4x32x32xf32, #tpu.memory_space<vmem>>, vector<4x32x32xf32>,
    return
  }
  func.func @transform_0(%arg0: i32) -> (i32, i32, i32) {
    %c0_i32 = arith.constant 0 : i32
    %c0_i32_0 = arith.constant 0 : i32
    %c0_i32_1 = arith.constant 0 : i32
    return %arg0, %c0_i32, %c0_i32_0 : i32, i32, i32
  }
  func.func @transform_1(%arg0: i32) -> (i32, i32) {
    %c0_i32 = arith.constant 0 : i32
    %c0_i32_0 = arith.constant 0 : i32
    %c0_i32_1 = arith.constant 0 : i32
    return %c0_i32, %c0_i32_0 : i32, i32
  }
  func.func @transform_2(%arg0: i32) -> (i32, i32) {
    %c0_i32 = arith.constant 0 : i32
    %c0_i32_0 = arith.constant 0 : i32
    %c0_i32_1 = arith.constant 0 : i32
    return %c0_i32, %c0_i32_0 : i32, i32
  }
  func.func @transform_3(%arg0: i32) -> (i32, i32) {
    %c0_i32 = arith.constant 0 : i32
    %c0_i32_0 = arith.constant 0 : i32
    %c0_i32_1 = arith.constant 0 : i32
    return %c0_i32, %c0_i32_0 : i32, i32
  }
  func.func @transform_4(%arg0: i32) -> (i32, i32, i32) {
    %c0_i32 = arith.constant 0 : i32
    %c0_i32_0 = arith.constant 0 : i32
    %c0_i32_1 = arith.constant 0 : i32
    return %arg0, %c0_i32, %c0_i32_0 : i32, i32, i32
  }
}

</mosaic_0001>

<bundles_post_ra>
// kernel: tile.19
= control target key start
LH: loop header
LB: loop body
LE: loop exit
PB: predicated region body
PF: predicated region fallthrough
CT: control target
= control target key end

     0   :  { %vm4_vm0 = vcmask 1046532   ;;  %s99_s14 = smov 112   ;;  %s100_s19 = smov 80   ;;  %vm6_vm1 = vcmask 130048   ;;  %vm16_vm2 = vcmask 1048448   ;;  %vm26_vm3 = vcmask 917248   ;;  %s196_s0 = inlined_call_operand.vmem [shape: f32[7,8,16], index: 0, kind: input, shape index: {}]   ;;  %s197_s1 = inlined_call_operand.vmem [shape: f32[7,128], index: 1, kind: output, shape index: {}]  }
   0x1   :  { %v78_v0 = vld [vmem:[%s196_s0 + $0x7] ss:$8 sm:$0xf]   ;;  %v82_v3 = vld [vmem:[%s196_s0 + $0x5] ss:$8 sm:$0xf]  }
   0x2   :  { %v79_v1 = vld [vmem:[%s196_s0 + $0x7] ss:$8 sm:$0x70]   ;;  %v83_v4 = vld [vmem:[%s196_s0 + $0x5] ss:$8 sm:$0x70]  }
   0x3   :  { %v13_v2 = vsel %vm4_vm0, %v79_v1, %v78_v0  ;;  %v33_v5 = vsel %vm4_vm0, %v83_v4, %v82_v3  ;;  %v80_v6 = vld [vmem:[%s196_s0 + $0x6] ss:$8 sm:$0xf]   ;;  %v84_v9 = vld [vmem:[%s196_s0 + $0x4] ss:$8 sm:$0xf]  }
   0x4   :  { %14 = vrot.lane.b32.xlu0 %v13_v2, %s99_s14  ;;  %v81_v7 = vld [vmem:[%s196_s0 + $0x6] ss:$8 sm:$0x70]   ;;  %34 = vrot.lane.b32.xlu1 %v33_v5, %s100_s19  ;;  %v85_v10 = vld [vmem:[%s196_s0 + $0x4] ss:$8 sm:$0x70]  }
   0x5   :  { %v23_v8 = vsel %vm4_vm0, %v81_v7, %v80_v6  ;;  %v86_v11 = vld [vmem:[%s196_s0 + $0x3] ss:$8 sm:$0xf]   ;;  %v43_v12 = vsel %vm4_vm0, %v85_v10, %v84_v9  ;;  %s101_s28 = smov 96   ;;  %s102_s4 = smov 64   ;;  %vm36_vm4 = vcmask 786048  }
   0x6   :  { %v87_v13 = vld [vmem:[%s196_s0 + $0x3] ss:$8 sm:$0x70]   ;;  %v88_v14 = vld [vmem:[%s196_s0 + $0x2] ss:$8 sm:$0xf]  }
   0x7   :  { %v89_v15 = vld [vmem:[%s196_s0 + $0x2] ss:$8 sm:$0x70]   ;;  %v53_v16 = vsel %vm4_vm0, %v87_v13, %v86_v11  ;;  %v90_v17 = vld [vmem:[%s196_s0 + $0x1] ss:$8 sm:$0xf]  }
   0x8   :  { %24 = vrot.lane.b32.xlu0 %v23_v8, %s101_s28  ;;  %44 = vrot.lane.b32.xlu1 %v43_v12, %s102_s4  ;;  %v63_v18 = vsel %vm4_vm0, %v89_v15, %v88_v14  ;;  %v91_v19 = vld [vmem:[%s196_s0 + $0x1] ss:$8 sm:$0x70]   ;;  %v2_v20 = vld [vmem:[%s196_s0] ss:$8 sm:$0xf]  }
   0x9   :  { %v3_v21 = vld [vmem:[%s196_s0] ss:$8 sm:$0x70]   ;;  %s103_s0 = smov 48   ;;  %s104_s13 = smov 32   ;;  %v73_v23 = vsel %vm4_vm0, %v91_v19, %v90_v17  ;;  %vm46_vm5 = vcmask 654848  }
   0xa   :  { %v5_v22 = vsel %vm4_vm0, %v3_v21, %v2_v20  ;;  %s105_s16 = smov 16   ;;  %vm56_vm6 = vcmask 523648   ;;  %vm66_vm7 = vcmask 392448   ;;  %vm76_vm8 = vcmask 261248  }
   0xb   :  { %7 = vst.msk [vmem:[%s197_s1] sm:$0x7f] %vm6_vm1, %v5_v22  }
   0xc   :  { %54 = vrot.lane.b32.xlu0 %v53_v16, %s103_s0  ;;  %64 = vrot.lane.b32.xlu1 %v63_v18, %s104_s13 }
  0x10   :  { %74 = vrot.lane.b32.xlu0 %v73_v23, %s105_s16 }
  0x76   :  { %v15_v24 = vpop.permute.xlu0 %14   ;;  %v35_v25 = vpop.permute.xlu1 %34  }
  0x77   :  { %17 = vst.msk [vmem:[%s197_s1] sm:$0x7f] %vm16_vm2, %v15_v24  }
  0x7a   :  { %v25_v26 = vpop.permute.xlu0 %24   ;;  %v45_v27 = vpop.permute.xlu1 %44  }
  0x7b   :  { %27 = vst.msk [vmem:[%s197_s1] sm:$0x7f] %vm26_vm3, %v25_v26  }
  0x7c   :  { %37 = vst.msk [vmem:[%s197_s1] sm:$0x7f] %vm36_vm4, %v35_v25  }
  0x7d   :  { %47 = vst.msk [vmem:[%s197_s1] sm:$0x7f] %vm46_vm5, %v45_v27  }
  0x7e   :  { %v55_v28 = vpop.permute.xlu0 %54   ;;  %v65_v29 = vpop.permute.xlu1 %64  }
  0x7f   :  { %57 = vst.msk [vmem:[%s197_s1] sm:$0x7f] %vm56_vm6, %v55_v28  }
  0x80   :  { %67 = vst.msk [vmem:[%s197_s1] sm:$0x7f] %vm66_vm7, %v65_v29  }
  0x82   :  { %v75_v30 = vpop.permute.xlu0 %74  }
  0x83   :  { %77 = vst.msk [vmem:[%s197_s1] sm:$0x7f] %vm76_vm8, %v75_v30  }

// kernel: input_embedder2_forward.3
= control target key start
LH: loop header
LB: loop body
LE: loop exit
PB: predicated region body
PF: predicated region fallthrough
CT: control target
= control target key end

     0   :  { %s561_s15 = smov 0   ;;  %s563_s16 = smov 0   ;;  %s664_s0 = inlined_call_operand.vmem [shape: f32[32,128], index: 0, kind: input, shape index: {}]   ;;  %s665_s1 = inlined_call_operand.vmem [shape: f32[1,512], index: 1, kind: input, shape index: {}]   ;;  %s666_s2 = inlined_call_operand.vmem [shape: s32[1,512], index: 2, kind: input, shape index: {}]   ;;  %s667_s3 = inlined_call_operand.vmem [shape: f32[7,128], index: 3, kind: input, shape index: {}]   ;;  %s668_s4 = inlined_call_operand.vmem [shape: f32[32,512], index: 4, kind: output, shape index: {}]  }
   0x1   :  { %s565_s17 = smov 0   ;;  %s567_s18 = smov 0  }
   0x2   :  { %s569_s19 = smov 0  }
   0x3 LB: > { %s23_s20 = sadd.s32 1, %s526_s17  ;;  %s26_s21 = sadd.s32 1, %s530_s18  ;;  %s534_s19 = sphi %s569_s19, %s14_s19   ;;  %s530_s18 = sphi %s567_s18, %s672_s18   ;;  %s526_s17 = sphi %s565_s17, %s671_s17   ;;  %s522_s16 = sphi %s563_s16, %s670_s16   ;;  %s518_s15 = sphi %s561_s15, %s669_s15  }
   0x4   : > { %p24_p0 = scmp.ge.s32.totalorder %s23_s20, 4  ;;  %p444_p1 = scmp.ge.s32.totalorder %s534_s19, 1 }
   0x5   : > { %p191_p2 = scmp.lt.s32.totalorder %s534_s19, 17 }
   0x6   : > { %s674_s20 = smov (%p24_p0, %s23_s20), 0  ;;  %s676_s21 = smov (!%p24_p0, %s26_s21), %s530_s18 }
   0x7   : > { %p192_p3 = pnand %p444_p1, %p191_p2  ;;  %p28_p4 = scmp.ge.s32.totalorder %s676_s21, 4 }
   0x8   : > { %p225_p5 = scmp.lt.s32.totalorder (!%p192_p3), %s522_s16, 3  ;;  %p229_p6 = scmp.lt.s32.totalorder (!%p192_p3), %s518_s15, 3  ;;  %v597_v0 = vld [vmem:[%s667_s3] sm:$0x7f] (!%p192_p3) }
   0x9   : > { %s678_s21 = smov (%p28_p4, %s676_s21), 0  ;;  %195 = sbr.rel (%p192_p3) target bundleno = 66 (0x42), region = 36 }
   0xa   : > { %s599_s24 = sshll.u32 (!%p192_p3), %s522_s16, 3  ;;  %s449_s25 = sshll.u32 (!%p192_p3), %s518_s15, 3 }
   0xb   : > { %s255_s13 = sadd.s32 (!%p192_p3), 7, %s599_s24 }
   0xc   : > { %s256_s23 = ssub.s32 (!%p192_p3), %s449_s25, %s255_s13 }
   0xd   : > { %p451_p7 = scmp.lt.s32.totalorder (!%p192_p3), %s256_s23, 3 }
  0x10   : > { %s680_s16 = smov (!%p225_p5, %s522_s16), 3  ;;  %s682_s15 = smov (!%p229_p6, %s518_s15), 3 }
  0x11   : > { %s445_s26 = sshll.u32 %s680_s16, 3  ;;  %s446_s27 = sshll.u32 %s680_s16, 2  ;;  %v263_v4 = vlaneseq (!%p451_p7) }
  0x12   : > { %s228_s30 = scalar_lea.vmem %s664_s0, %s445_s26  ;;  %s231_s7 = scalar_lea.vmem %s665_s1, %s682_s15 }
  0x13   : > { %s234_s10 = scalar_lea.vmem %s666_s2, %s682_s15  ;;  %s240_s11 = sadd.s32 %s446_s27, %s682_s15  ;;  %v245_v1 = vld [vmem:[%s228_s30] sm:$0xff]  ;;  %v264_v5 = vshrl.u32 (!%p451_p7), %v263_v4, 7 }
  0x14   : > { %v450_v2 = vld [vmem:[%s231_s7] ss:$0 sm:$0xff]  ;;  %s447_s12 = sshll.u32 %s240_s11, 3  ;;  %s257_s26 = sadd.s32 7, %s449_s25 }
  0x15   : > { %v617_v3 = vadd.f32 %v450_v2, %v245_v1  ;;  %s623_s22 = scalar_lea.vmem %s668_s4, %s447_s12  ;;  %s258_s28 = ssub.s32 %s257_s26, %s599_s24  ;;  %v265_v6 = vsub.s32 (!%p451_p7), 6, %v264_v5 }
  0x16   : > { %262 = sbr.rel (%p451_p7) target bundleno = 29 (0x1d), region = 40 }
  0x17   : > { %v266_v7 = vrot.slane (!%p451_p7), %v597_v0, %v265_v6 }
  0x19   : > { %v267_v8 = vadd.f32 (!%p451_p7), %v266_v7, %v617_v3 }
  0x1b   : > { %268 = vst [vmem:[%s623_s22] sm:$0xff] (!%p451_p7), %v267_v8 }
  0x1d PF: > { %p452_p8 = scmp.gt.s32.totalorder %s258_s28, 4294967293 }
  0x1e   : > { %v273_v9 = vlaneseq (!%p452_p8) }
  0x1f   : > { %272 = sbr.rel (%p452_p8) target bundleno = 41 (0x29), region = 44 }
  0x20   : > { %v274_v10 = vshrl.u32 (!%p452_p8), %v273_v9, 7 }
  0x22   : > { %v275_v11 = vsub.s32 (!%p452_p8), 0, %v274_v10 }
  0x24   : > { %v276_v12 = vrot.slane (!%p452_p8), %v597_v0, %v275_v11 }
  0x26   : > { %v277_v13 = vadd.f32 %v276_v12, %v617_v3 }
  0x28   : > { %278 = vst [vmem:[%s623_s22] sm:$0xff] %v277_v13 }
  0x29 PF: > { %p281_p9 = pnand %p452_p8, %p451_p7 }
  0x2a   : > { %v285_v14 = vlaneseq (!%p281_p9)  ;;  %v287_v15 = vstv (!%p281_p9), %s599_s24  ;;  %v453_v17 = vld [vmem:[%s234_s10] ss:$0 sm:$0xff] (!%p281_p9) }
  0x2b   : > { %284 = sbr.rel (%p281_p9) target bundleno = 66 (0x42), region = 48 }
  0x2c   : > { %v286_v16 = vshrl.u32 (!%p281_p9), %v285_v14, 7 }
  0x2e   : > { %v288_v18 = vadd.s32 (!%p281_p9), %v287_v15, %v286_v16  ;;  %v302_v20 = vsub.s32 (!%p281_p9), 0, %v286_v16  ;;  %v307_v21 = vsub.s32 (!%p281_p9), 1, %v286_v16  ;;  %v313_v22 = vsub.s32 (!%p281_p9), 2, %v286_v16 }
  0x2f   : > { %v319_v24 = vsub.s32 (!%p281_p9), 3, %v286_v16  ;;  %v325_v25 = vsub.s32 (!%p281_p9), 4, %v286_v16  ;;  %v331_v29 = vsub.s32 (!%p281_p9), 5, %v286_v16  ;;  %v337_v32 = vsub.s32 (!%p281_p9), 6, %v286_v16 }
  0x30   : > { %v294_v19 = vsub.s32 (!%p281_p9), %v453_v17, %v288_v18  ;;  %v303_v27 = vrot.slane (!%p281_p9), %v597_v0, %v302_v20  ;;  %v308_v28 = vrot.slane (!%p281_p9), %v597_v0, %v307_v21  ;;  %v314_v31 = vrot.slane (!%p281_p9), %v597_v0, %v313_v22 }
  0x31   : > { %v320_v33 = vrot.slane (!%p281_p9), %v597_v0, %v319_v24  ;;  %v326_v34 = vrot.slane (!%p281_p9), %v597_v0, %v325_v25  ;;  %v332_v36 = vrot.slane (!%p281_p9), %v597_v0, %v331_v29  ;;  %v338_v38 = vrot.slane (!%p281_p9), %v597_v0, %v337_v32 }
  0x32   : > { %vm295_vm0 = vcmp.gt.s32.totalorder %v294_v19, 4294967293 }
  0x33   : > { %v296_v23 = vsel %vm295_vm0, %v294_v19, 4294967293 }
  0x34   : > { %vm297_vm1 = vcmp.lt.s32.totalorder %v296_v23, 3 }
  0x35   : > { %v298_v26 = vsel %vm297_vm1, %v296_v23, 3 }
  0x36   : > { %v299_v30 = vadd.s32 3, %v298_v26 }
  0x38   : > { %vm304_vm2 = vcmp.eq.s32.totalorder %v299_v30, 1  ;;  %vm310_vm3 = vcmp.eq.s32.totalorder %v299_v30, 2  ;;  %vm316_vm4 = vcmp.eq.s32.totalorder %v299_v30, 3  ;;  %vm322_vm5 = vcmp.eq.s32.totalorder %v299_v30, 4 }
  0x39   : > { %v309_v35 = vsel %vm304_vm2, %v308_v28, %v303_v27  ;;  %vm328_vm6 = vcmp.eq.s32.totalorder %v299_v30, 5  ;;  %vm334_vm7 = vcmp.eq.s32.totalorder %v299_v30, 6 }
  0x3a   : > { %v315_v37 = vsel %vm310_vm3, %v314_v31, %v309_v35 }
  0x3b   : > { %v321_v39 = vsel %vm316_vm4, %v320_v33, %v315_v37 }
  0x3c   : > { %v327_v40 = vsel %vm322_vm5, %v326_v34, %v321_v39 }
  0x3d   : > { %v333_v41 = vsel %vm328_vm6, %v332_v36, %v327_v40 }
  0x3e   : > { %v339_v42 = vsel %vm334_vm7, %v338_v38, %v333_v41 }
  0x3f   : > { %v340_v43 = vadd.f32 %v339_v42, %v617_v3 }
  0x41   : > { %341 = vst [vmem:[%s623_s22] sm:$0xff] %v340_v43 }
  0x42 PF: > { %s14_s19 = sadd.s32 1, %s534_s19   ;;  %s669_s15 = smov %s526_s17 }
  0x43   : > { %p11_p10 = scmp.ge.s32.totalorder %s14_s19, 18   ;;  %s670_s16 = smov %s530_s18 }
  0x44   : > { %s671_s17 = smov %s674_s20  ;;  %s672_s18 = smov %s678_s21 }
  0x45   :  { %13 = sbr.rel (!%p11_p10) target bundleno = 3 (0x3), region = 84 }

// kernel: input_embedder2_forward.2
= control target key start
LH: loop header
LB: loop body
LE: loop exit
PB: predicated region body
PF: predicated region fallthrough
CT: control target
= control target key end

     0   :  { %9 = vsyncpa [#allocation3], 0  ;;  %s1022_s0 = inlined_call_operand.vmem [shape: f32[8,32,49], index: 0, kind: input, shape index: {}]   ;;  %s1023_s1 = inlined_call_operand.vmem [shape: f32[32,32], index: 1, kind: input, shape index: {}]   ;;  %s1024_s2 = inlined_call_operand.vmem [shape: f32[49,32], index: 2, kind: input, shape index: {}]   ;;  %s1025_s3 = inlined_call_operand.vmem [shape: f32[1,32], index: 3, kind: input, shape index: {}]   ;;  %s1026_s4 = inlined_call_operand.hbm [shape: f32[8,32,32], index: 4, kind: output, shape index: {}]  }
   0x1   :  { %11 = vsyncpa [#allocation3 + $0x1], 0  ;;  %s793_s15 = smov 0   ;;  %s795_s16 = smov 0  }
   0x2   :  { %s797_s17 = smov 0   ;;  %s799_s18 = smov 0  }
   0x3 LB: > { %s814_s19 = sadd.s32 4294967295, %s763_s18   ;;  %s544_s20 = sadd.s32 4294967294, %s763_s18   ;;  %s763_s18 = sphi %s799_s18, %s1032_s18   ;;  %s759_s17 = sphi %s797_s17, %s1031_s17   ;;  %s755_s16 = sphi %s795_s16, %s1030_s16   ;;  %s751_s15 = sphi %s793_s15, %s1029_s15  }
   0x4   : > { %s818_s21 = sadd.s32 1, %s763_s18   ;;  %s113_s22 = sadd.s32 1, %s759_s17 }
   0x5   : > { %s110_s23 = ssub.s32 %s763_s18, %s818_s21  ;;  %p123_p0 = scmp.ne.s32.totalorder %s759_s17, %s755_s16 }
   0x6   : > { %p111_p1 = scmp.eq.s32.totalorder %s110_s23, 0  ;;  %p124_p2 = scmp.eq.s32.totalorder %s814_s19, 1 }
   0x7   : > { %p129_p3 = scmp.ne.s32.totalorder %s755_s16, %s751_s15  ;;  %p130_p4 = scmp.eq.s32.totalorder %s544_s20, 1 }
   0x8   : > { %s829_s24 = scalar_select %p111_p1, %s759_s17, %s113_s22  }
   0x9   : > { %p831_p5 = por %p124_p2, %p123_p0  ;;  %p835_p6 = por %p130_p4, %p129_p3 }
   0xa   : > { %p547_p7 = scmp.ge.s32.totalorder %s763_s18, 1  ;;  %p167_p8 = scmp.lt.s32.totalorder %s763_s18, 3 }
   0xc   : > { %p168_p9 = pnand %p547_p7, %p167_p8 }
   0xd   : > { %v218_v0 = vld [vmem:[%s1024_s2] sm:$0xff] (!%p168_p9)  ;;  %v219_v1 = vld [vmem:[%s1024_s2 + $0x8] sm:$0xff] (!%p168_p9)  ;;  %v220_v2 = vld [vmem:[%s1024_s2 + $0x10] sm:$0xff] (!%p168_p9)  ;;  %s549_s7 = sshll.u32 (!%p168_p9), %s814_s19, 2  ;;  %vm232_vm0 = vcmask (!%p168_p9), 400384   ;;  %vm281_vm1 = vcmask (!%p168_p9), 1040384  }
   0xe   : > { %171 = sbr.rel (%p168_p9) target bundleno = 275 (0x113), region = 36  ;;  %v640_v3 = vpack.c.bf16 (!%p168_p9), %v219_v1, %v218_v0  ;;  %v221_v4 = vld [vmem:[%s1024_s2 + $0x18] sm:$0xff] (!%p168_p9)  ;;  %p195_p10 = scmp.lt.s32.totalorder (!%p168_p9), %s549_s7, 7  ;;  %v222_v6 = vld [vmem:[%s1024_s2 + $0x20] sm:$0xff] (!%p168_p9)  ;;  %v223_v7 = vld [vmem:[%s1024_s2 + $0x28] sm:$0xff] (!%p168_p9)  ;;  %vm450_vm2 = vcmask (!%p168_p9), 261120  }
   0xf   : > { %v644_v5 = vpack.c.bf16 (!%p168_p9), %v221_v4, %v220_v2  ;;  %v648_v8 = vpack.c.bf16 (!%p168_p9), %v223_v7, %v222_v6  ;;  %v224_v11 = vld [vmem:[%s1024_s2 + $0x30] sm:$0x1] (!%p168_p9)  ;;  %s191_s29 = sand.u32 (!%p168_p9), 1, %s755_s16   ;;  %v904_v26 = vld [vmem:[%s1025_s3] ss:$0 sm:$0xff] (!%p168_p9)  ;;  %v431_v28 = vld [vmem:[%s1023_s1 + $0x8] sm:$0xff] (!%p168_p9) }
  0x10   : > { %641 = vmatprep.subr.bf16.mxu0 (!%p168_p9), %v640_v3  ;;  %652 = vmatprep.subr.bf16.mxu1 (!%p168_p9), %v640_v3  ;;  %s548_s6 = sshll.u32 (!%p168_p9), %s191_s29, 7  ;;  %v430_v33 = vld [vmem:[%s1023_s1] sm:$0xff] (!%p168_p9)  ;;  %v433_v42 = vld [vmem:[%s1023_s1 + $0x18] sm:$0xff] (!%p168_p9)  ;;  %v432_v47 = vld [vmem:[%s1023_s1 + $0x10] sm:$0xff] (!%p168_p9)  ;;  %s578_s22 = sshll.u32 (!%p168_p9), %s814_s19, 11 }
  0x11   : > { %643 = vmatpush3.bf16.msra.mxu0 (!%p168_p9), %v640_v3  ;;  %656 = vmatpush3.bf16.msra.mxu1 (!%p168_p9), %v640_v3  ;;  %s921_s13 = scalar_lea.vmem (!%p168_p9), [#allocation2], %s548_s6  ;;  %s967_s28 = scalar_lea.hbm (!%p168_p9), %s1026_s4, %s578_s22 }
  0x12   : > { %645 = vmatprep.subr.bf16.mxu0 (!%p168_p9), %v644_v5  ;;  %653 = vmatprep.subr.bf16.mxu1 (!%p168_p9), %v644_v5  ;;  %s981_s30 = scalar_lea.sflag (!%p168_p9), [#allocation3], %s191_s29  ;;  %s765_s6 = smov (!%p168_p9), [#allocation2]  }
  0x15   : > { %s1034_s7 = smov (!%p195_p10, %s549_s7), 7  ;;  %647 = vmatpush3.bf16.msra.mxu0 %v644_v5  ;;  %657 = vmatpush3.bf16.msra.mxu1 %v644_v5 }
  0x16   : > { %s576_s14 = sshll.u32 %s1034_s7, 5  ;;  %649 = vmatprep.subr.bf16.mxu0 %v648_v8  ;;  %654 = vmatprep.subr.bf16.mxu1 %v648_v8  ;;  %s705_s7 = sshll.u32 %s765_s6, 4  ;;  %s706_s7 = int_to_ptr.vmem [resolvable:$false] %s705_s7 }
  0x17   : > { %s863_s23 = scalar_lea.vmem %s1022_s0, %s576_s14  ;;  %s707_s8 = scalar_lea.vmem %s706_s7, 4096 }
  0x18   : > { %v202_v9 = vld [vmem:[%s863_s23] sm:$0xff]  ;;  %v203_v12 = vld [vmem:[%s863_s23 + $0x8] sm:$0xff]  ;;  %v204_v14 = vld [vmem:[%s863_s23 + $0x10] sm:$0xff] }
  0x19   : > { %v210_v10 = vld [vmem:[%s863_s23 + $0x40] sm:$0xff]  ;;  %616 = vmatprep.mubr.msk.f32.mxu0 %vm232_vm0, %v202_v9  ;;  %651 = vmatpush3.bf16.msra.mxu0 %v648_v8  ;;  %v211_v13 = vld [vmem:[%s863_s23 + $0x48] sm:$0xff]  ;;  %v212_v15 = vld [vmem:[%s863_s23 + $0x50] sm:$0xff] }
  0x1a   : > { %628 = vmatprep.mubr.msk.f32.mxu1 %vm232_vm0, %v210_v10  ;;  %658 = vmatpush3.bf16.msra.mxu1 %v648_v8  ;;  %v205_v16 = vld [vmem:[%s863_s23 + $0x18] sm:$0xff]  ;;  %v206_v18 = vld [vmem:[%s863_s23 + $0x20] sm:$0xff]  ;;  %v207_v20 = vld [vmem:[%s863_s23 + $0x28] sm:$0xff] }
  0x1b   : > { %614 = vmatprep.subr.msk.mxu0 %vm281_vm1, %v224_v11  ;;  %655 = vmatprep.subr.msk.mxu1 %vm281_vm1, %v224_v11  ;;  %v213_v17 = vld [vmem:[%s863_s23 + $0x58] sm:$0xff]  ;;  %v214_v19 = vld [vmem:[%s863_s23 + $0x60] sm:$0xff]  ;;  %v215_v21 = vld [vmem:[%s863_s23 + $0x68] sm:$0xff] }
  0x1c   : > { %v208_v22 = vld [vmem:[%s863_s23 + $0x30] sm:$0xff]  ;;  %v209_v24 = vld [vmem:[%s863_s23 + $0x38] sm:$0xff] }
  0x1d   : > { %615 = vmatpush3.msk.msra.mxu0 %vm281_vm1, %v224_v11  ;;  %v216_v23 = vld [vmem:[%s863_s23 + $0x70] sm:$0xff]  ;;  %v217_v25 = vld [vmem:[%s863_s23 + $0x78] sm:$0xff]  ;;  %s482_s23 = sshll.u32 %s921_s13, 4  ;;  %s969_s23 = int_to_ptr.vmem [resolvable:$true] %s482_s23 }
  0x1e   : > { %659 = vmatpush3.msk.msra.mxu1 %vm281_vm1, %v224_v11  ;;  %617 = vmatmul.mubr.msk.f32.vlgmr.msra.gmra.mrb[0].mxu0 %vm232_vm0, %v203_v12  ;;  %s701_s5 = scalar_lea.vmem %s969_s23, 2048  ;;  %p708_p0 = scmp.lt.s32.totalorder %s969_s23, %s706_s7 }
  0x1f   : > { %629 = vmatmul.mubr.msk.f32.vlgmr.msra.gmra.mrb[0].mxu1 %vm232_vm0, %v211_v13  ;;  %619 = vmatprep.mubr.msk.f32.mxu0 %vm232_vm0, %v204_v14  ;;  %p702_p11 = scmp.ne.s32.totalorder %s969_s23, %s701_s5  ;;  %p709_p1 = scmp.lt.s32.totalorder %s707_s8, %s701_s5 }
  0x20   : > { %631 = vmatprep.mubr.msk.f32.mxu1 %vm232_vm0, %v212_v15 }
  0x21   : > { %p703_p12 = pnand %p702_p11, %p831_p5  ;;  %p710_p2 = por %p709_p1, %p708_p0 }
  0x22   : > { %620 = vmatmul.mubr.msk.f32.gmra.mrb[2].mxu0 %vm232_vm0, %v205_v16 }
  0x23   : > { %632 = vmatmul.mubr.msk.f32.gmra.mrb[2].mxu1 %vm232_vm0, %v213_v17  ;;  %622 = vmatprep.mubr.msk.f32.mxu0 %vm232_vm0, %v206_v18  ;;  %p704_p13 = pneg %p703_p12 }
  0x24   : > { %634 = vmatprep.mubr.msk.f32.mxu1 %vm232_vm0, %v214_v19 }
  0x25   : > { %p711_p3 = pnand %p710_p2, %p704_p13 }
  0x26   : > { %623 = vmatmul.mubr.msk.f32.gmra.mrb[4].mxu0 %vm232_vm0, %v207_v20 }
  0x27   : > { %635 = vmatmul.mubr.msk.f32.gmra.mrb[4].mxu1 %vm232_vm0, %v215_v21  ;;  %625 = vmatprep.mubr.msk.f32.mxu0 %vm232_vm0, %v208_v22 }
  0x28   : > { %637 = vmatprep.mubr.msk.f32.mxu1 %vm232_vm0, %v216_v23 }
  0x2a   : > { %626 = vmatmul.mubr.msk.f32.gmra.mrb[6].mxu0 %vm232_vm0, %v209_v24 }
  0x2b   : > { %638 = vmatmul.mubr.msk.f32.gmra.mrb[6].mxu1 %vm232_vm0, %v217_v25 }
  0xf1   : > { %v618_v27 = vpop.f32.mrb[0].mxu0 }
  0xf2   : > { %v630_v29 = vpop.f32.mrb[0].mxu1  ;;  %v357_v30 = vadd.f32 %v618_v27, %v904_v26  ;;  %v351_v32 = vpop.f32.mrb[1].mxu0 }
  0xf3   : > { %v397_v31 = vadd.f32 %v630_v29, %v904_v26  ;;  %v391_v34 = vpop.f32.mrb[1].mxu1  ;;  %v352_v35 = vadd.f32 %v904_v26, %v351_v32 }
  0xf4   : > { %v392_v36 = vadd.f32 %v904_v26, %v391_v34  ;;  %v435_v37 = vadd.f32 %v431_v28, %v357_v30 }
  0xf5   : > { %v443_v38 = vadd.f32 %v431_v28, %v397_v31  ;;  %v434_v39 = vadd.f32 %v430_v33, %v352_v35  ;;  %v621_v41 = vpop.f32.mrb[2].mxu0 }
  0xf6   : > { %v442_v40 = vadd.f32 %v430_v33, %v392_v36  ;;  %v633_v43 = vpop.f32.mrb[2].mxu1  ;;  %452 = vst.msk [vmem:[%s921_s13 + $0x8] sm:$0xff] %vm450_vm2, %v435_v37  ;;  %v367_v44 = vadd.f32 %v621_v41, %v904_v26  ;;  %v361_v46 = vpop.f32.mrb[3].mxu0 }
  0xf7   : > { %460 = vst.msk [vmem:[%s921_s13 + $0x48] sm:$0xff] %vm450_vm2, %v443_v38  ;;  %v407_v45 = vadd.f32 %v633_v43, %v904_v26  ;;  %v401_v48 = vpop.f32.mrb[3].mxu1  ;;  %451 = vst.msk [vmem:[%s921_s13] sm:$0xff] %vm450_vm2, %v434_v39  ;;  %v362_v49 = vadd.f32 %v904_v26, %v361_v46 }
  0xf8   : > { %459 = vst.msk [vmem:[%s921_s13 + $0x40] sm:$0xff] %vm450_vm2, %v442_v40  ;;  %v402_v50 = vadd.f32 %v904_v26, %v401_v48  ;;  %v437_v51 = vadd.f32 %v433_v42, %v367_v44 }
  0xf9   : > { %v445_v52 = vadd.f32 %v433_v42, %v407_v45  ;;  %v436_v53 = vadd.f32 %v432_v47, %v362_v49  ;;  %v624_v55 = vpop.f32.mrb[4].mxu0 }
  0xfa   : > { %v444_v54 = vadd.f32 %v432_v47, %v402_v50  ;;  %v636_v56 = vpop.f32.mrb[4].mxu1  ;;  %454 = vst.msk [vmem:[%s921_s13 + $0x18] sm:$0xff] %vm450_vm2, %v437_v51  ;;  %v377_v57 = vadd.f32 %v624_v55, %v904_v26  ;;  %v371_v59 = vpop.f32.mrb[5].mxu0 }
  0xfb   : > { %462 = vst.msk [vmem:[%s921_s13 + $0x58] sm:$0xff] %vm450_vm2, %v445_v52  ;;  %v417_v58 = vadd.f32 %v636_v56, %v904_v26  ;;  %v411_v60 = vpop.f32.mrb[5].mxu1  ;;  %453 = vst.msk [vmem:[%s921_s13 + $0x10] sm:$0xff] %vm450_vm2, %v436_v53  ;;  %v372_v61 = vadd.f32 %v904_v26, %v371_v59 }
  0xfc   : > { %461 = vst.msk [vmem:[%s921_s13 + $0x50] sm:$0xff] %vm450_vm2, %v444_v54  ;;  %v412_v62 = vadd.f32 %v904_v26, %v411_v60  ;;  %v439_v63 = vadd.f32 %v431_v28, %v377_v57 }
  0xfd   : > { %v447_v0 = vadd.f32 %v431_v28, %v417_v58  ;;  %v438_v1 = vadd.f32 %v430_v33, %v372_v61  ;;  %v627_v3 = vpop.f32.mrb[6].mxu0 }
  0xfe   : > { %v446_v2 = vadd.f32 %v430_v33, %v412_v62  ;;  %v639_v4 = vpop.f32.mrb[6].mxu1  ;;  %456 = vst.msk [vmem:[%s921_s13 + $0x28] sm:$0xff] %vm450_vm2, %v439_v63  ;;  %v387_v5 = vadd.f32 %v627_v3, %v904_v26  ;;  %v381_v7 = vpop.f32.mrb[7].mxu0 }
  0xff   : > { %464 = vst.msk [vmem:[%s921_s13 + $0x68] sm:$0xff] %vm450_vm2, %v447_v0  ;;  %v427_v6 = vadd.f32 %v639_v4, %v904_v26  ;;  %v421_v8 = vpop.f32.mrb[7].mxu1  ;;  %455 = vst.msk [vmem:[%s921_s13 + $0x20] sm:$0xff] %vm450_vm2, %v438_v1  ;;  %v382_v9 = vadd.f32 %v904_v26, %v381_v7 }
 0x100   : > { %463 = vst.msk [vmem:[%s921_s13 + $0x60] sm:$0xff] %vm450_vm2, %v446_v2  ;;  %v422_v10 = vadd.f32 %v904_v26, %v421_v8  ;;  %v441_v11 = vadd.f32 %v433_v42, %v387_v5 }
 0x101   : > { %v449_v12 = vadd.f32 %v433_v42, %v427_v6  ;;  %v440_v13 = vadd.f32 %v432_v47, %v382_v9 }
 0x102   : > { %v448_v14 = vadd.f32 %v432_v47, %v422_v10  ;;  %458 = vst.msk [vmem:[%s921_s13 + $0x38] sm:$0xff] %vm450_vm2, %v441_v11 }
 0x103   : > { %466 = vst.msk [vmem:[%s921_s13 + $0x78] sm:$0xff] %vm450_vm2, %v449_v12  ;;  %457 = vst.msk [vmem:[%s921_s13 + $0x30] sm:$0xff] %vm450_vm2, %v440_v13 }
 0x104   : > { %465 = vst.msk [vmem:[%s921_s13 + $0x70] sm:$0xff] %vm450_vm2, %v448_v14 }
 0x105   : > { %714 = shalt.err (!%p711_p3)
}
 0x106   : > { %s715_s29 = scalar_lea.hbm %s967_s28, 2048  ;;  %s719_s11 = scalar_lea.hbm %s1026_s4, 4096 }
 0x107   : > { %p716_p4 = scmp.ne.s32.totalorder %s967_s28, %s715_s29  ;;  %p720_p9 = scmp.lt.u32.totalorder %s967_s28, %s1026_s4 }
 0x108   : > { %p721_p10 = scmp.lt.u32.totalorder %s719_s11, %s715_s29  ;;  %p723_p12 = scmp.lt.u32.totalorder %s715_s29, %s967_s28 }
 0x109   : > { %p717_p7 = pnand %p716_p4, %p831_p5 }
 0x10a   : > { %p722_p11 = por %p721_p10, %p720_p9 }
 0x10b   : > { %p718_p8 = pneg %p717_p7 }
 0x10c   : > { %p724_p13 = por %p723_p12, %p722_p11 }
 0x10e   : > { %p725_p0 = pnand %p724_p13, %p718_p8 }
 0x110   : > { %728 = shalt.err (!%p725_p0)
}
 0x111   : > { %s766_s14 = smov 128   ;;  %s767_s20 = smov 8  }
 0x112   : > { %660 = dma.vmem_to_hbm [thread:$0]  (%p831_p5), %s969_s23, 2048, %s967_s28, %s981_s30, %s766_s14, %s766_s14, %s767_s20  }
 0x113 PF: > { %p666_p1 = scmp.ge.s32.totalorder %s763_s18, 2  ;;  %s497_s22 = sand.u32 1, %s751_s15  }
 0x114   : > { %s498_s19 = scalar_lea.sflag [#allocation3], %s497_s22 }
 0x115   : > { %p663_p2 = pnand %p666_p1, %p835_p6 }
 0x117   : > { %746 = dma.done.wait (!%p663_p2), %s498_s19, 2048  }
 0x118   : > { %748 = vsyncadd (!%p663_p2), %s498_s19, 4294965248  ;;  %p14_p3 = scmp.ge.s32.totalorder %s818_s21, 4   ;;  %s1029_s15 = smov %s755_s16 }
 0x119   : > { %s1030_s16 = smov %s759_s17  ;;  %s1031_s17 = smov %s829_s24 }
 0x11a   : > { %s1032_s18 = smov %s818_s21  ;;  %16 = sbr.rel (!%p14_p3) target bundleno = 3 (0x3), region = 71 }
 0x121   :  { %503 = vsyncpa [#allocation3], 1 }
 0x122   :  { %505 = vsyncpa [#allocation3 + $0x1], 1 }

</bundles_post_ra>
